<compile_context>
chip_gen: v7x
topology: tpu7x:2x2x1
jax: 0.10.0
libtpu: 0.0.40
codegen_flags: <defaults>
</compile_context>

<pallas_src>
import functools

import jax
import jax.numpy as jnp
from jax.experimental import pallas as pl
from jax.experimental.pallas import tpu as pltpu


def _round_up(v, m):
    return (v + m - 1) // m * m


def _lstm_gcn_kernel(x_ref, mo_ref, mi_ref, wg_ref, bg_ref, wl_ref, out_ref,
                     *, K: int, Fh_pad: int):
    f32 = jnp.float32

    def dot(a, b):
        return jnp.dot(a, b, preferred_element_type=f32)

    x = x_ref[...]                # (N, Fin)  f32
    mo = mo_ref[...]              # (N, N)    f32   A^T D_out^{-1}
    mi = mi_ref[...]              # (N, N)    f32   A   D_in^{-1}

    # Chebyshev-style diffusion bases (T0 = X shared by both directions).
    out_b, in_b = [x], [x]
    if K > 1:
        out_b.append(dot(mo, x))
        in_b.append(dot(mi, x))
    for _ in range(2, K):
        out_b.append(2.0 * dot(mo, out_b[-1]) - out_b[-2])
        in_b.append(2.0 * dot(mi, in_b[-1]) - in_b[-2])
    bases = out_b + in_b          # 2K blocks, each (N, Fin) f32

    # Fused update (z) + candidate (h~) gates.  wg_ref[b] is the (Fin, 2*Fh_pad)
    # weight slab for diffusion basis b; columns [0:Fh_pad) -> z gate,
    # [Fh_pad:) -> candidate gate.  H_prev == 0, so the reset gate and all
    # H-side DConv terms vanish and were dropped in the wrapper.
    pre = bg_ref[...]                                  # (1, 2*Fh_pad), broadcasts over N
    for b, t in enumerate(bases):
        pre = pre + dot(t, wg_ref[b])                  # (N, 2*Fh_pad) f32

    z = jax.nn.sigmoid(pre[:, :Fh_pad])                # 128-lane aligned slices
    h_tilde = jnp.tanh(pre[:, Fh_pad:])
    # DCRNN GRU update with H_prev = 0:  H = z*0 + (1-z)*h_tilde ;  then ReLU.
    h = jnp.maximum((1.0 - z) * h_tilde, 0.0)

    # Final Linear: weights in rows [0:Fh_pad), bias folded in as row Fh_pad.
    wl = wl_ref[...]                                   # (Fh_pad + 1, Fout_pad) f32
    y = dot(h, wl[:Fh_pad, :]) + wl[Fh_pad:Fh_pad + 1, :]
    out_ref[...] = y.astype(out_ref.dtype)


def lstm_gcn_forward(x, edge_index, edge_weight, params, K):
    """Full LSTMGCNModel.forward: h = DCRNN(x, A); h = relu(h); h = Linear(h)."""
    N, Fin = x.shape
    Fh = params["wz_x"].shape[-1]
    Fout = params["w_lin"].shape[-1]
    Fh_pad = _round_up(Fh, 128)      # lane-dense gate width
    Fout_pad = _round_up(Fout, 128)  # lane-dense output width

    f32 = jnp.float32

    # Dense random-walk diffusion operators with a zero-degree guard
    # (isolated nodes would otherwise inject inf/NaN into the matmuls).
    A = jnp.zeros((N, N), f32).at[edge_index[0], edge_index[1]].add(edge_weight.astype(f32))
    deg_out = A.sum(axis=1)
    deg_in = A.sum(axis=0)
    inv_out = jnp.where(deg_out > 0, 1.0 / deg_out, 0.0)
    inv_in = jnp.where(deg_in > 0, 1.0 / deg_in, 0.0)
    m_out = (A.T * inv_out[None, :]).astype(f32)   # forward diffusion  A^T D_out^{-1}
    m_in = (A * inv_in[None, :]).astype(f32)       # reverse diffusion  A   D_in^{-1}

    # Pack the z / h~ X-side gate weights into one (2K, Fin, 2*Fh_pad) slab
    # (basis-major: out_0 .. out_{K-1}, in_0 .. in_{K-1}); gate biases into one
    # (1, 2*Fh_pad) row.  r-gate and all H-side weights dropped (H_prev==0).
    def pad_fh(w):  # (..., Fh) -> (..., Fh_pad)
        return jnp.pad(w, [(0, 0)] * (w.ndim - 1) + [(0, Fh_pad - Fh)])

    wz = pad_fh(params["wz_x"]).reshape(2 * K, Fin, Fh_pad)
    wh = pad_fh(params["wh_x"]).reshape(2 * K, Fin, Fh_pad)
    wg = jnp.concatenate([wz, wh], axis=-1).astype(f32)                 # (2K, Fin, 2*Fh_pad)
    bg = jnp.concatenate([pad_fh(params["bz"]), pad_fh(params["bh"])], axis=-1).astype(f32)

    # Final Linear, lane-padded to 128, bias folded in as the last row.
    wl = jnp.pad(params["w_lin"], ((0, Fh_pad - Fh), (0, Fout_pad - Fout)))
    bl = jnp.pad(params["b_lin"], ((0, 0), (0, Fout_pad - Fout)))
    wl = jnp.concatenate([wl, bl], axis=0).astype(f32)                  # (Fh_pad+1, Fout_pad)

    inputs = (x.astype(f32), m_out, m_in, wg, bg, wl)

    # Advisory cost estimate (the kernel is launch/overhead-bound at toy sizes).
    flops = 4 * max(K - 1, 0) * N * N * Fin           # diffusion matmuls (both directions)
    flops += 2 * (2 * K) * N * Fin * (2 * Fh_pad)     # fused z/h~ gate matmuls
    flops += 2 * N * Fh_pad * Fout_pad                # final linear
    transcendentals = 2 * N * Fh_pad                  # sigmoid + tanh
    bytes_accessed = sum(int(a.size) * a.dtype.itemsize for a in inputs) + N * Fout_pad * 4

    # Single grid point, all operands fully VMEM-resident (tiny shapes).  For
    # large graphs, tile the (N, N) diffusion matrices over node blocks with a
    # grid (smaller tiles on v7x) instead.
    vmem = functools.partial(pl.BlockSpec, memory_space=pltpu.MemorySpace.VMEM)
    y_pad = pl.pallas_call(
        functools.partial(_lstm_gcn_kernel, K=K, Fh_pad=Fh_pad),
        out_shape=jax.ShapeDtypeStruct((N, Fout_pad), f32),
        in_specs=[vmem() for _ in inputs],
        out_specs=vmem(),
        cost_estimate=pl.CostEstimate(flops=int(flops),
                                      transcendentals=int(transcendentals),
                                      bytes_accessed=int(bytes_accessed)),
    )(*inputs)
    return y_pad[:, :Fout]   # drop lane padding outside the kernel


def init_params(key, Fin, Fh, Fout, K):
    keys = jax.random.split(key, 10)

    def glorot(k, shape):
        fan_in, fan_out = shape[-2], shape[-1]
        lim = (6.0 / (fan_in + fan_out)) ** 0.5
        return jax.random.uniform(k, shape, jnp.float32, -lim, lim)

    p = {}
    for i, g in enumerate("zrh"):
        # DConv weight shape in torch: (2, K, Fin+Fh, Fh); split X / H column blocks.
        w = glorot(keys[2 * i], (2, K, Fin + Fh, Fh))
        p[f"w{g}_x"] = w[:, :, :Fin, :]
        p[f"w{g}_h"] = w[:, :, Fin:, :]
        p[f"b{g}"] = 0.01 * jax.random.normal(keys[2 * i + 1], (1, Fh), jnp.float32)
    # nn.Linear(Fh, Fout): store W^T so y = h @ w_lin + b_lin.
    p["w_lin"] = glorot(keys[6], (Fh, Fout))
    lim = 1.0 / (Fh ** 0.5)
    p["b_lin"] = jax.random.uniform(keys[7], (1, Fout), jnp.float32, -lim, lim)
    return p


def _reference(x, edge_index, edge_weight, p, K):
    # Plain-JAX replica of the FULL DCRNN math (zero hidden state and r-gate
    # included) in f32, so it also validates the h0==0 simplification and the
    # weight packing performed in the wrapper.
    f32 = jnp.float32
    N = x.shape[0]
    Fh = p["wz_x"].shape[-1]
    A = jnp.zeros((N, N), f32).at[edge_index[0], edge_index[1]].add(edge_weight.astype(f32))
    deg_out, deg_in = A.sum(axis=1), A.sum(axis=0)
    m_out = A.T * jnp.where(deg_out > 0, 1.0 / deg_out, 0.0)[None, :]
    m_in = A * jnp.where(deg_in > 0, 1.0 / deg_in, 0.0)[None, :]
    h0 = jnp.zeros((N, Fh), f32)

    def dot(a, b):
        return jnp.dot(a.astype(f32), b.astype(f32), preferred_element_type=f32)

    def bases(t):
        o, i_ = [t], [t]
        if K > 1:
            o.append(dot(m_out, t)); i_.append(dot(m_in, t))
        for _ in range(2, K):
            o.append(2.0 * dot(m_out, o[-1]) - o[-2])
            i_.append(2.0 * dot(m_in, i_[-1]) - i_[-2])
        return o, i_

    def dconv(xo, xi, ho, hi, wx, wh, b):
        acc = b
        for k in range(K):
            acc = acc + dot(xo[k], wx[0, k]) + dot(xi[k], wx[1, k])
            acc = acc + dot(ho[k], wh[0, k]) + dot(hi[k], wh[1, k])
        return acc

    xo, xi = bases(x)
    ho, hi = bases(h0)
    z = jax.nn.sigmoid(dconv(xo, xi, ho, hi, p["wz_x"], p["wz_h"], p["bz"]))
    r = jax.nn.sigmoid(dconv(xo, xi, ho, hi, p["wr_x"], p["wr_h"], p["br"]))
    ro, ri = bases(r * h0)
    ht = jnp.tanh(dconv(xo, xi, ro, ri, p["wh_x"], p["wh_h"], p["bh"]))
    h = z * h0 + (1.0 - z) * ht
    h = jnp.maximum(h, 0.0)
    return dot(h, p["w_lin"]) + p["b_lin"]


if __name__ == "__main__":
    N, Fin, Fh, Fout, K = 16, 4, 32, 8, 2

    key = jax.random.PRNGKey(0)
    k_x, k_w, k_p = jax.random.split(key, 3)

    # Node features.
    x = jax.random.normal(k_x, (N, Fin), jnp.float32)

    # Bidirectional ring graph -> every node has nonzero in/out degree.
    src = jnp.concatenate([jnp.arange(N), (jnp.arange(N) + 1) % N])
    dst = jnp.concatenate([(jnp.arange(N) + 1) % N, jnp.arange(N)])
    edge_index = jnp.stack([src, dst]).astype(jnp.int32)          # (2, 2N)
    edge_weight = jax.random.uniform(k_w, (2 * N,), jnp.float32, 0.5, 1.5)

    params = init_params(k_p, Fin, Fh, Fout, K)

    fwd = jax.jit(lstm_gcn_forward, static_argnames=("K",))
    out = fwd(x, edge_index, edge_weight, params, K=K)
    out = jax.block_until_ready(out)

    ref = _reference(x, edge_index, edge_weight, params, K)
    assert out.shape == (N, Fout)
    assert bool(jnp.all(jnp.isfinite(out)))
    assert bool(jnp.allclose(out, ref, atol=1e-3, rtol=1e-3)), "mismatch vs JAX reference"

    print("KERNEL_OK")
</pallas_src>

<mosaic_0001>
module attributes {stable_mosaic.version = 11 : i64} {
  func.func private @main(%arg0: i32) attributes {dimension_semantics = [#tpu.dimension_semantics<core_parallel>], iteration_bounds = array<i64: 2>, tpu.core_type = #tpu.core_type<sc_scalar_subcore>, window_params = []} {
    return
  }
}

module attributes {stable_mosaic.version = 11 : i64} {
  func.func private @main(%arg0: i32) attributes {dimension_semantics = [#tpu.dimension_semantics<core_parallel>], iteration_bounds = array<i64: 2>, tpu.core_type = #tpu.core_type<sc_scalar_subcore>, window_params = []} {
    return
  }
}

module attributes {stable_mosaic.version = 11 : i64} {
  func.func @_lstm_gcn_kernel(%arg0: memref<16x4xf32, #tpu.memory_space<vmem>>, %arg1: memref<16x16xf32, #tpu.memory_space<vmem>>, %arg2: memref<16x16xf32, #tpu.memory_space<vmem>>, %arg3: memref<4x4x256xf32, #tpu.memory_space<vmem>>, %arg4: memref<1x256xf32, #tpu.memory_space<vmem>>, %arg5: memref<129x128xf32, #tpu.memory_space<vmem>>, %arg6: memref<16x128xf32, #tpu.memory_space<vmem>>) attributes {dimension_semantics = [], scalar_prefetch = 0 : i64, scratch_operands = 0 : i64, tpu.core_type = #tpu.core_type<tc>} {
    %c0 = arith.constant 0 : index
    %c0_0 = arith.constant 0 : index
    %0 = vector.load %arg0[%c0, %c0_0] : memref<16x4xf32, #tpu.memory_space<vmem>>, vector<16x4xf32>
    %c0_1 = arith.constant 0 : index
    %c0_2 = arith.constant 0 : index
    %1 = vector.load %arg1[%c0_1, %c0_2] : memref<16x16xf32, #tpu.memory_space<vmem>>, vector<16x16xf32>
    %c0_3 = arith.constant 0 : index
    %c0_4 = arith.constant 0 : index
    %2 = vector.load %arg2[%c0_3, %c0_4] : memref<16x16xf32, #tpu.memory_space<vmem>>, vector<16x16xf32>
    %cst = arith.constant dense<0.000000e+00> : vector<16x4xf32>
    %3 = tpu.matmul %1, %0, %cst {dimension_numbers = #tpu.dot_dimension_numbers<[1], [0], [0], [1], [0, 0, 1, 1], [], []>} : vector<16x16xf32>, vector<16x4xf32>, vector<16x4xf32> -> vector<16x4xf32>
    %cst_5 = arith.constant dense<0.000000e+00> : vector<16x4xf32>
    %4 = tpu.matmul %2, %0, %cst_5 {dimension_numbers = #tpu.dot_dimension_numbers<[1], [0], [0], [1], [0, 0, 1, 1], [], []>} : vector<16x16xf32>, vector<16x4xf32>, vector<16x4xf32> -> vector<16x4xf32>
    %c0_6 = arith.constant 0 : index
    %c0_7 = arith.constant 0 : index
    %5 = vector.load %arg4[%c0_6, %c0_7] : memref<1x256xf32, #tpu.memory_space<vmem>>, vector<1x256xf32>
    %c0_8 = arith.constant 0 : index
    %c0_9 = arith.constant 0 : index
    %c0_10 = arith.constant 0 : index
    %6 = vector.load %arg3[%c0_8, %c0_9, %c0_10] : memref<4x4x256xf32, #tpu.memory_space<vmem>>, vector<1x4x256xf32>
    %7 = vector.shape_cast %6 : vector<1x4x256xf32> to vector<4x256xf32>
    %cst_11 = arith.constant dense<0.000000e+00> : vector<16x256xf32>
    %8 = tpu.matmul %0, %7, %cst_11 {dimension_numbers = #tpu.dot_dimension_numbers<[1], [0], [0], [1], [0, 0, 1, 1], [], []>} : vector<16x4xf32>, vector<4x256xf32>, vector<16x256xf32> -> vector<16x256xf32>
    %9 = vector.broadcast %5 : vector<1x256xf32> to vector<16x256xf32>
    %10 = arith.addf %9, %8 : vector<16x256xf32>
    %c1 = arith.constant 1 : index
    %c0_12 = arith.constant 0 : index
    %c0_13 = arith.constant 0 : index
    %11 = vector.load %arg3[%c1, %c0_12, %c0_13] : memref<4x4x256xf32, #tpu.memory_space<vmem>>, vector<1x4x256xf32>
    %12 = vector.shape_cast %11 : vector<1x4x256xf32> to vector<4x256xf32>
    %cst_14 = arith.constant dense<0.000000e+00> : vector<16x256xf32>
    %13 = tpu.matmul %3, %12, %cst_14 {dimension_numbers = #tpu.dot_dimension_numbers<[1], [0], [0], [1], [0, 0, 1, 1], [], []>} : vector<16x4xf32>, vector<4x256xf32>, vector<16x256xf32> -> vector<16x256xf32>
    %14 = arith.addf %10, %13 : vector<16x256xf32>
    %c2 = arith.constant 2 : index
    %c0_15 = arith.constant 0 : index
    %c0_16 = arith.constant 0 : index
    %15 = vector.load %arg3[%c2, %c0_15, %c0_16] : memref<4x4x256xf32, #tpu.memory_space<vmem>>, vector<1x4x256xf32>
    %16 = vector.shape_cast %15 : vector<1x4x256xf32> to vector<4x256xf32>
    %cst_17 = arith.constant dense<0.000000e+00> : vector<16x256xf32>
    %17 = tpu.matmul %0, %16, %cst_17 {dimension_numbers = #tpu.dot_dimension_numbers<[1], [0], [0], [1], [0, 0, 1, 1], [], []>} : vector<16x4xf32>, vector<4x256xf32>, vector<16x256xf32> -> vector<16x256xf32>
    %18 = arith.addf %14, %17 : vector<16x256xf32>
    %c3 = arith.constant 3 : index
    %c0_18 = arith.constant 0 : index
    %c0_19 = arith.constant 0 : index
    %19 = vector.load %arg3[%c3, %c0_18, %c0_19] : memref<4x4x256xf32, #tpu.memory_space<vmem>>, vector<1x4x256xf32>
    %20 = vector.shape_cast %19 : vector<1x4x256xf32> to vector<4x256xf32>
    %cst_20 = arith.constant dense<0.000000e+00> : vector<16x256xf32>
    %21 = tpu.matmul %4, %20, %cst_20 {dimension_numbers = #tpu.dot_dimension_numbers<[1], [0], [0], [1], [0, 0, 1, 1], [], []>} : vector<16x4xf32>, vector<4x256xf32>, vector<16x256xf32> -> vector<16x256xf32>
    %22 = arith.addf %18, %21 : vector<16x256xf32>
    %23 = vector.extract_strided_slice %22 {offsets = [0, 0], sizes = [16, 128], strides = [1, 1]} : vector<16x256xf32> to vector<16x128xf32>
    %24 = arith.negf %23 : vector<16x128xf32>
    %25 = math.exp %24 : vector<16x128xf32>
    %cst_21 = arith.constant 1.000000e+00 : f32
    %26 = vector.broadcast %cst_21 : f32 to vector<16x128xf32>
    %27 = arith.addf %26, %25 : vector<16x128xf32>
    %28 = arith.divf %26, %27 : vector<16x128xf32>
    %29 = vector.extract_strided_slice %22 {offsets = [0, 128], sizes = [16, 128], strides = [1, 1]} : vector<16x256xf32> to vector<16x128xf32>
    %30 = math.tanh %29 : vector<16x128xf32>
    %cst_22 = arith.constant 1.000000e+00 : f32
    %31 = vector.broadcast %cst_22 : f32 to vector<16x128xf32>
    %32 = arith.subf %31, %28 : vector<16x128xf32>
    %33 = arith.mulf %32, %30 : vector<16x128xf32>
    %cst_23 = arith.constant 0.000000e+00 : f32
    %34 = vector.broadcast %cst_23 : f32 to vector<16x128xf32>
    %35 = arith.maximumf %33, %34 : vector<16x128xf32>
    %c0_24 = arith.constant 0 : index
    %c0_25 = arith.constant 0 : index
    %36 = vector.load %arg5[%c0_24, %c0_25] : memref<129x128xf32, #tpu.memory_space<vmem>>, vector<129x128xf32>
    %37 = vector.extract_strided_slice %36 {offsets = [0, 0], sizes = [128, 128], strides = [1, 1]} : vector<129x128xf32> to vector<128x128xf32>
    %cst_26 = arith.constant dense<0.000000e+00> : vector<16x128xf32>
    %38 = tpu.matmul %35, %37, %cst_26 {dimension_numbers = #tpu.dot_dimension_numbers<[1], [0], [0], [1], [0, 0, 1, 1], [], []>} : vector<16x128xf32>, vector<128x128xf32>, vector<16x128xf32> -> vector<16x128xf32>
    %39 = vector.extract_strided_slice %36 {offsets = [128, 0], sizes = [1, 128], strides = [1, 1]} : vector<129x128xf32> to vector<1x128xf32>
    %40 = vector.broadcast %39 : vector<1x128xf32> to vector<16x128xf32>
    %41 = arith.addf %38, %40 : vector<16x128xf32>
    %c0_27 = arith.constant 0 : index
    %c0_28 = arith.constant 0 : index
    %42 = vector.load %arg6[%c0_27, %c0_28] : memref<16x128xf32, #tpu.memory_space<vmem>>, vector<16x128xf32>
    tpu.vector_store %arg6[%c0_27, %c0_28], %41 {strides = array<i32>} : memref<16x128xf32, #tpu.memory_space<vmem>>, vector<16x128xf32>,
    return
  }
}

</mosaic_0001>

<bundles_post_ra>
// kernel: lstm_gcn_forward.1
= control target key start
LH: loop header
LB: loop body
LE: loop exit
PB: predicated region body
PF: predicated region fallthrough
CT: control target
= control target key end

     0   :  { %vm29_vm0 = vcmask 130048   ;;  %vm203_vm1 = vcmask 1043456   ;;  %v875_v11 = vmov 0.0   ;;  %vm196_vm2 = vcmask 31744   ;;  %s1021_s0 = inlined_call_operand.vmem [shape: f32[16,4], index: 0, kind: input, shape index: {}]   ;;  %s1022_s1 = inlined_call_operand.vmem [shape: f32[16,16], index: 1, kind: input, shape index: {}]   ;;  %s1023_s2 = inlined_call_operand.vmem [shape: f32[16,16], index: 2, kind: input, shape index: {}]   ;;  %s1024_s3 = inlined_call_operand.vmem [shape: f32[4,4,256], index: 3, kind: input, shape index: {}]   ;;  %s1025_s5 = inlined_call_operand.vmem [shape: f32[129,128], index: 5, kind: input, shape index: {}]   ;;  %s1026_s4 = inlined_call_operand.vmem [shape: f32[1,256], index: 4, kind: input, shape index: {}]   ;;  %s1027_s6 = inlined_call_operand.vmem [shape: f32[16,128], index: 6, kind: output, shape index: {}]  }
   0x1   :  { %v23_v0 = vld [vmem:[%s1021_s0] sm:$0xff]  ;;  %v24_v1 = vld [vmem:[%s1021_s0 + $0x8] sm:$0xff]  ;;  %v714_v12 = vld [vmem:[%s1024_s3 + $0x10] sm:$0xff]  ;;  %v286_v44 = vlaneseq }
   0x2   :  { %v25_v2 = vld [vmem:[%s1022_s1] sm:$0xff]  ;;  %v802_v3 = vpack.c.bf16 %v24_v1, %v23_v0  ;;  %v709_v6 = vld [vmem:[%s1024_s3 + $0x8] sm:$0xff]  ;;  %v398_v13 = vcombine.high %v714_v12, %v714_v12  ;;  %v719_v14 = vld [vmem:[%s1024_s3 + $0x18] sm:$0xff] }
   0x3   :  { %757 = vmatprep.mubr.msk.f32.mxu0 %vm29_vm0, %v25_v2  ;;  %v27_v4 = vld [vmem:[%s1023_s2] sm:$0xff]  ;;  %v26_v8 = vld [vmem:[%s1022_s1 + $0x8] sm:$0xff]  ;;  %v303_v10 = vcombine.high %v709_v6, %v709_v6  ;;  %v487_v16 = vcombine.high %v719_v14, %v719_v14  ;;  %v601_v23 = vld [vmem:[%s1025_s5 + $0x10] sm:$0xff]  ;;  %v287_v45 = vshrl.u32 %v286_v44, 7 }
   0x4   :  { %764 = vmatprep.mubr.msk.f32.mxu1 %vm29_vm0, %v27_v4  ;;  %v193_v5 = vld [vmem:[%s1024_s3] sm:$0xff]  ;;  %803 = vmatprep.subr.bf16.mxu0 %v802_v3  ;;  %v28_v9 = vld [vmem:[%s1023_s2 + $0x8] sm:$0xff]  ;;  %v602_v24 = vld [vmem:[%s1025_s5 + $0x18] sm:$0xff] }
   0x5   :  { %807 = vmatprep.subr.bf16.mxu1 %v802_v3  ;;  %v195_v7 = vcombine.high %v193_v5, %v193_v5  ;;  %805 = vmatpush3.bf16.msra.mxu0 %v802_v3  ;;  %v599_v20 = vld [vmem:[%s1025_s5] sm:$0xff]  ;;  %v600_v21 = vld [vmem:[%s1025_s5 + $0x8] sm:$0xff]  ;;  %v814_v25 = vpack.c.bf16 %v602_v24, %v601_v23  ;;  %v605_v29 = vld [vmem:[%s1025_s5 + $0x30] sm:$0xff]  ;;  %v288_v46 = vsub.s32 0, %v287_v45  ;;  %v292_v57 = vsub.s32 1, %v287_v45 }
   0x6   :  { %809 = vmatpush3.bf16.msra.mxu1 %v802_v3  ;;  %v810_v22 = vpack.c.bf16 %v600_v21, %v599_v20  ;;  %v603_v26 = vld [vmem:[%s1025_s5 + $0x20] sm:$0xff]  ;;  %v604_v27 = vld [vmem:[%s1025_s5 + $0x28] sm:$0xff]  ;;  %v606_v30 = vld [vmem:[%s1025_s5 + $0x38] sm:$0xff] }
   0x7   :  { %705 = vmatprep.subr.msk.mxu0 %vm203_vm1, %v195_v7  ;;  %v818_v28 = vpack.c.bf16 %v604_v27, %v603_v26  ;;  %v822_v31 = vpack.c.bf16 %v606_v30, %v605_v29  ;;  %v607_v32 = vld [vmem:[%s1025_s5 + $0x40] sm:$0xff]  ;;  %v608_v33 = vld [vmem:[%s1025_s5 + $0x48] sm:$0xff]  ;;  %v609_v35 = vld [vmem:[%s1025_s5 + $0x50] sm:$0xff] }
   0x8   :  { %758 = vmatmul.mubr.msk.f32.vlgmr.msra.gmra.mrb[0].mxu0 %vm29_vm0, %v26_v8  ;;  %811 = vmatprep.subr.bf16.mxu1 %v810_v22  ;;  %v826_v34 = vpack.c.bf16 %v608_v33, %v607_v32  ;;  %v610_v36 = vld [vmem:[%s1025_s5 + $0x58] sm:$0xff]  ;;  %v611_v38 = vld [vmem:[%s1025_s5 + $0x60] sm:$0xff]  ;;  %v612_v39 = vld [vmem:[%s1025_s5 + $0x68] sm:$0xff] }
   0x9   :  { %765 = vmatmul.mubr.msk.f32.vlgmr.msra.gmra.mrb[0].mxu1 %vm29_vm0, %v28_v9  ;;  %706 = vmatpush1.msk.msra.mxu0 %vm203_vm1, %v193_v5  ;;  %v830_v37 = vpack.c.bf16 %v610_v36, %v609_v35  ;;  %v834_v40 = vpack.c.bf16 %v612_v39, %v611_v38  ;;  %v613_v41 = vld [vmem:[%s1025_s5 + $0x70] sm:$0xff]  ;;  %v614_v42 = vld [vmem:[%s1025_s5 + $0x78] sm:$0xff]  ;;  %v192_v47 = vld [vmem:[%s1026_s4] sm:$0x3] }
   0xa   :  { %272 = vmatprep.mubr.f32.mxu0 %v875_v11  ;;  %710 = vmatprep.subr.msk.mxu0 %vm203_vm1, %v303_v10  ;;  %v838_v43 = vpack.c.bf16 %v614_v42, %v613_v41  ;;  %v289_v48 = vrot.slane %v192_v47, %v288_v46  ;;  %v293_v58 = vrot.slane %v192_v47, %v292_v57 }
   0xb   :  { %813 = vmatpush3.bf16.msra.mxu1 %v810_v22 }
   0xc   :  { %707 = vmatmul.mubr.msk.f32.vlgmr.msra.gmra.mrb[2].mxu0 %vm196_vm2, %v23_v0  ;;  %815 = vmatprep.subr.bf16.mxu1 %v814_v25 }
   0xd   :  { %711 = vmatpush1.msk.msra.mxu0 %vm203_vm1, %v709_v6  ;;  %278 = vmatprep.mubr.f32.mxu0 %v875_v11 }
   0xe   :  { %715 = vmatprep.subr.msk.mxu0 %vm203_vm1, %v398_v13 }
   0xf   :  { %817 = vmatpush3.bf16.msra.mxu1 %v814_v25 }
  0x10   :  { %708 = vmatmul.mubr.msk.f32.gmra.mrb[4].mxu0 %vm196_vm2, %v24_v1  ;;  %819 = vmatprep.subr.bf16.mxu1 %v818_v28 }
  0x11   :  { %378 = vmatprep.mubr.f32.mxu0 %v875_v11 }
  0x13   :  { %821 = vmatpush3.bf16.msra.mxu1 %v818_v28 }
  0x14   :  { %823 = vmatprep.subr.bf16.mxu1 %v822_v31 }
  0x17   :  { %825 = vmatpush3.bf16.msra.mxu1 %v822_v31 }
  0x18   :  { %827 = vmatprep.subr.bf16.mxu1 %v826_v34 }
  0x1b   :  { %829 = vmatpush3.bf16.msra.mxu1 %v826_v34 }
  0x1c   :  { %831 = vmatprep.subr.bf16.mxu1 %v830_v37 }
  0x1f   :  { %833 = vmatpush3.bf16.msra.mxu1 %v830_v37 }
  0x20   :  { %835 = vmatprep.subr.bf16.mxu1 %v834_v40 }
  0x23   :  { %837 = vmatpush3.bf16.msra.mxu1 %v834_v40 }
  0x24   :  { %839 = vmatprep.subr.bf16.mxu1 %v838_v43 }
  0x27   :  { %841 = vmatpush3.bf16.msra.mxu1 %v838_v43 }
  0xdb   :  { %v759_v15 = vpop.f32.mrb[0].mxu0 }
  0xdc   :  { %v766_v17 = vpop.f32.mrb[0].mxu1  ;;  %v102_v18 = vpop.f32.mrb[1].mxu0 }
  0xdd   :  { %v183_v19 = vpop.f32.mrb[1].mxu1  ;;  %712 = vmatmul.mubr.msk.f32.vlgmr.msra.gmra.mrb[2].mxu0 %vm196_vm2, %v102_v18 }
  0xde   :  { %716 = vmatpush1.msk.msra.mxu0 %vm203_vm1, %v714_v12  ;;  %384 = vmatprep.mubr.f32.mxu0 %v875_v11 }
  0xdf   :  { %720 = vmatprep.subr.msk.mxu0 %vm203_vm1, %v487_v16 }
  0xe1   :  { %713 = vmatmul.mubr.msk.f32.gmra.mrb[4].mxu0 %vm196_vm2, %v759_v15 }
  0xe2   :  { %467 = vmatprep.mubr.f32.mxu0 %v875_v11 }
  0xe5   :  { %717 = vmatmul.mubr.msk.f32.vlgmr.msra.gmra.mrb[2].mxu0 %vm196_vm2, %v23_v0 }
  0xe6   :  { %721 = vmatpush1.msk.msra.mxu0 %vm203_vm1, %v719_v14  ;;  %473 = vmatprep.mubr.f32.mxu0 %v875_v11 }
  0xe9   :  { %718 = vmatmul.mubr.msk.f32.gmra.mrb[4].mxu0 %vm196_vm2, %v24_v1 }
  0xea   :  { %562 = vmatprep.mubr.f32.mxu0 %v875_v11 }
  0xed   :  { %722 = vmatmul.mubr.msk.f32.vlgmr.msra.gmra.mrb[2].mxu0 %vm196_vm2, %v183_v19 }
  0xee   :  { %568 = vmatprep.mubr.f32.mxu0 %v875_v11  ;;  %v726_v11 = vld [vmem:[%s1025_s5 + $0x80] ss:$0 sm:$0xff] }
  0xf1   :  { %723 = vmatmul.mubr.msk.f32.gmra.mrb[4].mxu0 %vm196_vm2, %v766_v17 }
 0x1c0   :  { %v564_v49 = vpop.f32.mrb[2].mxu0 }
 0x1c1   :  { %v842_v50 = vadd.f32 %v564_v49, %v289_v48  ;;  %v566_v51 = vpop.f32.mrb[3].mxu0 }
 0x1c2   :  { %v843_v61 = vadd.f32 %v566_v51, %v293_v58 }
 0x1c3   :  { %v724_v52 = vmul.f32 -1.442695, %v842_v50 }
 0x1c4   :  { %v570_v53 = vpop.f32.mrb[4].mxu0 }
 0x1c5   :  { %863 = vpow2.f32 %v724_v52  ;;  %v844_v54 = vadd.f32 %v570_v53, %v289_v48  ;;  %v572_v55 = vpop.f32.mrb[5].mxu0 }
 0x1c6   :  { %v845_v0 = vadd.f32 %v572_v55, %v293_v58 }
 0x1c7   :  { %v725_v56 = vmul.f32 -1.442695, %v844_v54 }
 0x1c9   :  { %865 = vpow2.f32 %v725_v56 }
 0x1cf   :  { %v864_v59 = vpop.eup %863 }
 0x1d0   :  { %v585_v60 = vadd.f32 1.0, %v864_v59 }
 0x1d2   :  { %867 = vrcp.f32 %v585_v60 }
 0x1d3   :  { %v866_v62 = vpop.eup %865  ;;  %869 = vtanh.f32 %v843_v61 }
 0x1d4   :  { %v586_v63 = vadd.f32 1.0, %v866_v62 }
 0x1d6   :  { %871 = vrcp.f32 %v586_v63 }
 0x1d7   :  { %873 = vtanh.f32 %v845_v0 }
 0x1dc   :  { %v868_v1 = vpop.eup %867 }
 0x1dd   :  { %v593_v2 = vsub.f32 1.0, %v868_v1  ;;  %v870_v3 = vpop.eup %869 }
 0x1df   :  { %v595_v4 = vmul.f32 %v870_v3, %v593_v2 }
 0x1e0   :  { %v872_v5 = vpop.eup %871 }
 0x1e1   :  { %v594_v6 = vsub.f32 1.0, %v872_v5  ;;  %v597_v7 = vmax.f32 %v595_v4, 0.0  ;;  %v874_v8 = vpop.eup %873 }
 0x1e3   :  { %799 = vmatprep.mubr.f32.mxu1 %v597_v7  ;;  %v596_v9 = vmul.f32 %v874_v8, %v594_v6 }
 0x1e5   :  { %v598_v10 = vmax.f32 %v596_v9, 0.0 }
 0x1e7   :  { %800 = vmatmul.mubr.f32.vlgmr.msra.gmra.mrb[2].mxu1 %v598_v10 }
 0x2ba   :  { %v801_v12 = vpop.f32.mrb[2].mxu1 }
 0x2bb   :  { %v692_v13 = vadd.f32 %v801_v12, %v726_v11  ;;  %v686_v14 = vpop.f32.mrb[3].mxu1 }
 0x2bc   :  { %v687_v15 = vadd.f32 %v726_v11, %v686_v14 }
 0x2bd   :  { %696 = vst [vmem:[%s1027_s6 + $0x8] sm:$0xff] %v692_v13 }
 0x2be   :  { %695 = vst [vmem:[%s1027_s6] sm:$0xff] %v687_v15 }

</bundles_post_ra>
